<compile_context>
chip_gen: v7x
topology: tpu7x:2x2x1
jax: 0.10.0
libtpu: 0.0.40
codegen_flags: <defaults>
</compile_context>

<pallas_src>
import functools
import math

import jax
import jax.numpy as jnp
from jax.experimental import pallas as pl
from jax.experimental.pallas import tpu as pltpu

PAD = 128  # lane-dense padded feature width (all dims here are <= 128)


def _round_up(x, m):
    return ((x + m - 1) // m) * m


# ----------------------------- Pallas kernels ------------------------------


def _fused_ae_kernel(x_ref, w_ref, b_ref, z_ref, xt_ref, *, n_enc, n_total):
    """Encoder + decoder fused: 6 x (matmul + bias [+ ReLU]) on one batch tile.

    x_ref : (TB, P)            padded input activations
    w_ref : (n_total, P, P)    zero-padded weight stack (VMEM-resident)
    b_ref : (>=n_total, P)     zero-padded bias slab (VMEM-resident)
    z_ref : (TB, P)            padded latent output (valid cols [:z_dim])
    xt_ref: (TB, P)            padded reconstruction (valid cols [:x_dim])
    """
    h = x_ref[...]
    for l in range(n_total):  # static unroll: single live activation tile
        y = jnp.dot(h, w_ref[l], preferred_element_type=jnp.float32)
        y = y + b_ref[l:l + 1, :]
        if l == n_enc - 1:            # last encoder layer: no ReLU, emit z
            h = y
            z_ref[...] = y.astype(z_ref.dtype)
        elif l == n_total - 1:        # last decoder layer: no ReLU, emit x~
            xt_ref[...] = y.astype(xt_ref.dtype)
        else:                         # hidden layer: ReLU
            h = jnp.maximum(y, 0.0)


def _fused_mlp_kernel(x_ref, w_ref, b_ref, o_ref, *, n_layers):
    """Generic fused MLP (ReLU between layers, none on the last)."""
    h = x_ref[...]
    for l in range(n_layers):
        y = jnp.dot(h, w_ref[l], preferred_element_type=jnp.float32)
        y = y + b_ref[l:l + 1, :]
        h = jnp.maximum(y, 0.0) if l < n_layers - 1 else y
    o_ref[...] = h.astype(o_ref.dtype)


# ----------------------------- call wrappers --------------------------------


def _batch_tiling(batch):
    tb = min(256, _round_up(batch, 8))
    batch_pad = _round_up(batch, tb)
    return tb, batch_pad


def _pad_input(x, batch_pad, in_dim):
    batch = x.shape[0]
    xp = jnp.zeros((batch_pad, PAD), x.dtype)
    return xp.at[:batch, :in_dim].set(x)


def fused_autoencoder_call(x, w_stack, b_stack, *, n_enc, in_dim, z_dim, x_dim):
    """One pallas_call producing (z_tilde, x_tilde)."""
    batch = x.shape[0]
    n_total = w_stack.shape[0]
    tb, batch_pad = _batch_tiling(batch)
    x_pad = _pad_input(x, batch_pad, in_dim)

    kernel = functools.partial(_fused_ae_kernel, n_enc=n_enc, n_total=n_total)
    z_pad, xt_pad = pl.pallas_call(
        kernel,
        out_shape=(
            jax.ShapeDtypeStruct((batch_pad, PAD), x.dtype),
            jax.ShapeDtypeStruct((batch_pad, PAD), x.dtype),
        ),
        grid_spec=pltpu.PrefetchScalarGridSpec(
            num_scalar_prefetch=0,
            grid=(batch_pad // tb,),
            in_specs=[
                pl.BlockSpec((tb, PAD), lambda i: (i, 0)),           # x tile
                pl.BlockSpec(w_stack.shape, lambda i: (0, 0, 0)),    # weights
                pl.BlockSpec(b_stack.shape, lambda i: (0, 0)),       # biases
            ],
            out_specs=[
                pl.BlockSpec((tb, PAD), lambda i: (i, 0)),           # z
                pl.BlockSpec((tb, PAD), lambda i: (i, 0)),           # x_tilde
            ],
        ),
        compiler_params=pltpu.CompilerParams(
            dimension_semantics=("parallel",),
        ),
    )(x_pad, w_stack, b_stack)
    return z_pad[:batch, :z_dim], xt_pad[:batch, :x_dim]


def fused_mlp_call(x, w_stack, b_stack, *, in_dim, out_dim):
    """One pallas_call running a padded MLP stack (used by encode/decode)."""
    batch = x.shape[0]
    n_layers = w_stack.shape[0]
    tb, batch_pad = _batch_tiling(batch)
    x_pad = _pad_input(x, batch_pad, in_dim)

    kernel = functools.partial(_fused_mlp_kernel, n_layers=n_layers)
    out = pl.pallas_call(
        kernel,
        out_shape=jax.ShapeDtypeStruct((batch_pad, PAD), x.dtype),
        grid_spec=pltpu.PrefetchScalarGridSpec(
            num_scalar_prefetch=0,
            grid=(batch_pad // tb,),
            in_specs=[
                pl.BlockSpec((tb, PAD), lambda i: (i, 0)),
                pl.BlockSpec(w_stack.shape, lambda i: (0, 0, 0)),
                pl.BlockSpec(b_stack.shape, lambda i: (0, 0)),
            ],
            out_specs=pl.BlockSpec((tb, PAD), lambda i: (i, 0)),
        ),
        compiler_params=pltpu.CompilerParams(
            dimension_semantics=("parallel",),
        ),
    )(x_pad, w_stack, b_stack)
    return out[:batch, :out_dim]


# --------------------------- Model (glue in JAX) ----------------------------


def init_padded_mlp_params(key, layer_dims):
    """Init an MLP matching get_mlp's layer structure, zero-padded to PAD.

    U(-1/sqrt(fan_in), 1/sqrt(fan_in)) like torch.nn.Linear's default (values
    differ, shapes/semantics identical; synthetic kernel, not a checkpoint).
    Returns (list of (PAD, PAD) weights, list of (PAD,) biases).
    """
    ws, bs = [], []
    for i in range(len(layer_dims) - 1):
        d_in, d_out = layer_dims[i], layer_dims[i + 1]
        key, kw, kb = jax.random.split(key, 3)
        bound = 1.0 / math.sqrt(d_in)
        w = jax.random.uniform(kw, (d_in, d_out), jnp.float32, -bound, bound)
        b = jax.random.uniform(kb, (d_out,), jnp.float32, -bound, bound)
        w_pad = jnp.zeros((PAD, PAD), jnp.float32).at[:d_in, :d_out].set(w)
        b_pad = jnp.zeros((PAD,), jnp.float32).at[:d_out].set(b)
        ws.append(w_pad)
        bs.append(b_pad)
    return ws, bs


class CondNoiseAutoencoderPallas:
    """Deterministic encoder/decoder autoencoder (stoch_enc=stoch_dec=False,
    raw_io=False, no invariant-mass constraints)."""

    # TODO(synk): stochastic (stoch=True) branch with cond_noise_nn + sampled
    # eps, and the inv_masses / output_stats un-standardization branch are not
    # exercised by the default CondNoiseAutoencoder config and are omitted.

    def __init__(self, x_dim, z_dim, hidden_layer_dims, key):
        self.x_dim = x_dim
        self.z_dim = z_dim
        enc_dims = [x_dim, *hidden_layer_dims, z_dim]
        dec_dims = [z_dim, *list(reversed(hidden_layer_dims)), x_dim]

        k_enc, k_dec = jax.random.split(key)
        enc_ws, enc_bs = init_padded_mlp_params(k_enc, enc_dims)
        dec_ws, dec_bs = init_padded_mlp_params(k_dec, dec_dims)

        self.n_enc = len(enc_ws)
        self.n_total = self.n_enc + len(dec_ws)

        # Single weight stack + single lane-dense bias slab (rows padded to 8).
        self.w_stack = jnp.stack(enc_ws + dec_ws)                # (n_total,P,P)
        b_rows = _round_up(self.n_total, 8)
        b = jnp.zeros((b_rows, PAD), jnp.float32)
        self.b_stack = b.at[: self.n_total].set(jnp.stack(enc_bs + dec_bs))

    def encode(self, x):
        return fused_mlp_call(
            x,
            self.w_stack[: self.n_enc],
            self.b_stack[: self.n_enc],
            in_dim=self.x_dim,
            out_dim=self.z_dim,
        )

    def decode(self, z):
        return fused_mlp_call(
            z,
            self.w_stack[self.n_enc: self.n_total],
            self.b_stack[self.n_enc: self.n_total],
            in_dim=self.z_dim,
            out_dim=self.x_dim,
        )

    def __call__(self, x):
        # Fully fused forward: one pallas_call for encoder + decoder.
        return fused_autoencoder_call(
            x,
            self.w_stack,
            self.b_stack,
            n_enc=self.n_enc,
            in_dim=self.x_dim,
            z_dim=self.z_dim,
            x_dim=self.x_dim,
        )


# ------------------------- pure-JAX reference check -------------------------


def _reference_forward(x, model):
    """Same math in plain jnp on the padded parameters (zero-padding is exact)."""
    h = jnp.zeros((x.shape[0], PAD), x.dtype).at[:, : model.x_dim].set(x)
    z_ref = None
    for l in range(model.n_total):
        y = h @ model.w_stack[l] + model.b_stack[l][None, :]
        if l == model.n_enc - 1:
            z_ref = y
            h = y
        elif l == model.n_total - 1:
            h = y
        else:
            h = jnp.maximum(y, 0.0)
    return z_ref[:, : model.z_dim], h[:, : model.x_dim]


# --------------------------------- main -------------------------------------

if __name__ == "__main__":
    key = jax.random.PRNGKey(0)
    k_data, k_model = jax.random.split(key)

    batch = 8
    x_dim = 16
    z_dim = 8
    hidden_layer_dims = [32, 24]

    x = jax.random.normal(k_data, (batch, x_dim), dtype=jnp.float32)

    model = CondNoiseAutoencoderPallas(x_dim, z_dim, hidden_layer_dims, k_model)

    z_tilde, x_tilde = model(x)
    jax.block_until_ready((z_tilde, x_tilde))

    assert z_tilde.shape == (batch, z_dim), z_tilde.shape
    assert x_tilde.shape == (batch, x_dim), x_tilde.shape
    assert jnp.all(jnp.isfinite(z_tilde)) and jnp.all(jnp.isfinite(x_tilde))

    # Correctness vs. pure-JAX reference of the same math.
    z_ref, x_ref = _reference_forward(x, model)
    assert jnp.allclose(z_tilde, z_ref, atol=1e-5, rtol=1e-5)
    assert jnp.allclose(x_tilde, x_ref, atol=1e-5, rtol=1e-5)

    # encode/decode helpers agree with the fused forward.
    z2 = model.encode(x)
    x2 = model.decode(z2)
    jax.block_until_ready((z2, x2))
    assert jnp.allclose(z2, z_tilde, atol=1e-5, rtol=1e-5)
    assert jnp.allclose(x2, x_tilde, atol=1e-5, rtol=1e-5)

    print("KERNEL_OK")
</pallas_src>

<mosaic_0001>
module attributes {stable_mosaic.version = 11 : i64} {
  func.func @_fused_ae_kernel(%arg0: i32, %arg1: memref<8x128xf32, #tpu.memory_space<vmem>>, %arg2: memref<6x128x128xf32, #tpu.memory_space<vmem>>, %arg3: memref<8x128xf32, #tpu.memory_space<vmem>>, %arg4: memref<8x128xf32, #tpu.memory_space<vmem>>, %arg5: memref<8x128xf32, #tpu.memory_space<vmem>>) attributes {dimension_semantics = [#tpu.dimension_semantics<parallel>], iteration_bounds = array<i64: 1>, scalar_prefetch = 0 : i64, scratch_operands = 0 : i64, tpu.core_type = #tpu.core_type<tc>, window_params = [{transform_indices = @transform_0, window_bounds = array<i64: 8, 128>}, {pipeline_mode = #tpu.pipeline_mode<synchronous>, transform_indices = @transform_1, window_bounds = array<i64: 6, 128, 128>}, {pipeline_mode = #tpu.pipeline_mode<synchronous>, transform_indices = @transform_2, window_bounds = array<i64: 8, 128>}, {transform_indices = @transform_3, window_bounds = array<i64: 8, 128>}, {transform_indices = @transform_4, window_bounds = array<i64: 8, 128>}]} {
    %c0 = arith.constant 0 : index
    %c0_0 = arith.constant 0 : index
    %0 = vector.load %arg1[%c0, %c0_0] : memref<8x128xf32, #tpu.memory_space<vmem>>, vector<8x128xf32>
    %c0_1 = arith.constant 0 : index
    %c0_2 = arith.constant 0 : index
    %c0_3 = arith.constant 0 : index
    %1 = vector.load %arg2[%c0_1, %c0_2, %c0_3] : memref<6x128x128xf32, #tpu.memory_space<vmem>>, vector<1x128x128xf32>
    %2 = vector.shape_cast %1 : vector<1x128x128xf32> to vector<128x128xf32>
    %cst = arith.constant dense<0.000000e+00> : vector<8x128xf32>
    %3 = tpu.matmul %0, %2, %cst {dimension_numbers = #tpu.dot_dimension_numbers<[1], [0], [0], [1], [0, 0, 1, 1], [], []>} : vector<8x128xf32>, vector<128x128xf32>, vector<8x128xf32> -> vector<8x128xf32>
    %c0_4 = arith.constant 0 : index
    %c0_5 = arith.constant 0 : index
    %4 = vector.load %arg3[%c0_4, %c0_5] : memref<8x128xf32, #tpu.memory_space<vmem>>, vector<1x128xf32>
    %5 = vector.broadcast %4 : vector<1x128xf32> to vector<8x128xf32>
    %6 = arith.addf %3, %5 : vector<8x128xf32>
    %cst_6 = arith.constant 0.000000e+00 : f32
    %7 = vector.broadcast %cst_6 : f32 to vector<8x128xf32>
    %8 = arith.maximumf %6, %7 : vector<8x128xf32>
    %c1 = arith.constant 1 : index
    %c0_7 = arith.constant 0 : index
    %c0_8 = arith.constant 0 : index
    %9 = vector.load %arg2[%c1, %c0_7, %c0_8] : memref<6x128x128xf32, #tpu.memory_space<vmem>>, vector<1x128x128xf32>
    %10 = vector.shape_cast %9 : vector<1x128x128xf32> to vector<128x128xf32>
    %cst_9 = arith.constant dense<0.000000e+00> : vector<8x128xf32>
    %11 = tpu.matmul %8, %10, %cst_9 {dimension_numbers = #tpu.dot_dimension_numbers<[1], [0], [0], [1], [0, 0, 1, 1], [], []>} : vector<8x128xf32>, vector<128x128xf32>, vector<8x128xf32> -> vector<8x128xf32>
    %c1_10 = arith.constant 1 : index
    %c0_11 = arith.constant 0 : index
    %12 = vector.load %arg3[%c1_10, %c0_11] : memref<8x128xf32, #tpu.memory_space<vmem>>, vector<1x128xf32>
    %13 = vector.broadcast %12 : vector<1x128xf32> to vector<8x128xf32>
    %14 = arith.addf %11, %13 : vector<8x128xf32>
    %cst_12 = arith.constant 0.000000e+00 : f32
    %15 = vector.broadcast %cst_12 : f32 to vector<8x128xf32>
    %16 = arith.maximumf %14, %15 : vector<8x128xf32>
    %c2 = arith.constant 2 : index
    %c0_13 = arith.constant 0 : index
    %c0_14 = arith.constant 0 : index
    %17 = vector.load %arg2[%c2, %c0_13, %c0_14] : memref<6x128x128xf32, #tpu.memory_space<vmem>>, vector<1x128x128xf32>
    %18 = vector.shape_cast %17 : vector<1x128x128xf32> to vector<128x128xf32>
    %cst_15 = arith.constant dense<0.000000e+00> : vector<8x128xf32>
    %19 = tpu.matmul %16, %18, %cst_15 {dimension_numbers = #tpu.dot_dimension_numbers<[1], [0], [0], [1], [0, 0, 1, 1], [], []>} : vector<8x128xf32>, vector<128x128xf32>, vector<8x128xf32> -> vector<8x128xf32>
    %c2_16 = arith.constant 2 : index
    %c0_17 = arith.constant 0 : index
    %20 = vector.load %arg3[%c2_16, %c0_17] : memref<8x128xf32, #tpu.memory_space<vmem>>, vector<1x128xf32>
    %21 = vector.broadcast %20 : vector<1x128xf32> to vector<8x128xf32>
    %22 = arith.addf %19, %21 : vector<8x128xf32>
    %c0_18 = arith.constant 0 : index
    %c0_19 = arith.constant 0 : index
    %23 = vector.load %arg4[%c0_18, %c0_19] : memref<8x128xf32, #tpu.memory_space<vmem>>, vector<8x128xf32>
    tpu.vector_store %arg4[%c0_18, %c0_19], %22 {strides = array<i32>} : memref<8x128xf32, #tpu.memory_space<vmem>>, vector<8x128xf32>,
    %c3 = arith.constant 3 : index
    %c0_20 = arith.constant 0 : index
    %c0_21 = arith.constant 0 : index
    %24 = vector.load %arg2[%c3, %c0_20, %c0_21] : memref<6x128x128xf32, #tpu.memory_space<vmem>>, vector<1x128x128xf32>
    %25 = vector.shape_cast %24 : vector<1x128x128xf32> to vector<128x128xf32>
    %cst_22 = arith.constant dense<0.000000e+00> : vector<8x128xf32>
    %26 = tpu.matmul %22, %25, %cst_22 {dimension_numbers = #tpu.dot_dimension_numbers<[1], [0], [0], [1], [0, 0, 1, 1], [], []>} : vector<8x128xf32>, vector<128x128xf32>, vector<8x128xf32> -> vector<8x128xf32>
    %c3_23 = arith.constant 3 : index
    %c0_24 = arith.constant 0 : index
    %27 = vector.load %arg3[%c3_23, %c0_24] : memref<8x128xf32, #tpu.memory_space<vmem>>, vector<1x128xf32>
    %28 = vector.broadcast %27 : vector<1x128xf32> to vector<8x128xf32>
    %29 = arith.addf %26, %28 : vector<8x128xf32>
    %cst_25 = arith.constant 0.000000e+00 : f32
    %30 = vector.broadcast %cst_25 : f32 to vector<8x128xf32>
    %31 = arith.maximumf %29, %30 : vector<8x128xf32>
    %c4 = arith.constant 4 : index
    %c0_26 = arith.constant 0 : index
    %c0_27 = arith.constant 0 : index
    %32 = vector.load %arg2[%c4, %c0_26, %c0_27] : memref<6x128x128xf32, #tpu.memory_space<vmem>>, vector<1x128x128xf32>
    %33 = vector.shape_cast %32 : vector<1x128x128xf32> to vector<128x128xf32>
    %cst_28 = arith.constant dense<0.000000e+00> : vector<8x128xf32>
    %34 = tpu.matmul %31, %33, %cst_28 {dimension_numbers = #tpu.dot_dimension_numbers<[1], [0], [0], [1], [0, 0, 1, 1], [], []>} : vector<8x128xf32>, vector<128x128xf32>, vector<8x128xf32> -> vector<8x128xf32>
    %c4_29 = arith.constant 4 : index
    %c0_30 = arith.constant 0 : index
    %35 = vector.load %arg3[%c4_29, %c0_30] : memref<8x128xf32, #tpu.memory_space<vmem>>, vector<1x128xf32>
    %36 = vector.broadcast %35 : vector<1x128xf32> to vector<8x128xf32>
    %37 = arith.addf %34, %36 : vector<8x128xf32>
    %cst_31 = arith.constant 0.000000e+00 : f32
    %38 = vector.broadcast %cst_31 : f32 to vector<8x128xf32>
    %39 = arith.maximumf %37, %38 : vector<8x128xf32>
    %c5 = arith.constant 5 : index
    %c0_32 = arith.constant 0 : index
    %c0_33 = arith.constant 0 : index
    %40 = vector.load %arg2[%c5, %c0_32, %c0_33] : memref<6x128x128xf32, #tpu.memory_space<vmem>>, vector<1x128x128xf32>
    %41 = vector.shape_cast %40 : vector<1x128x128xf32> to vector<128x128xf32>
    %cst_34 = arith.constant dense<0.000000e+00> : vector<8x128xf32>
    %42 = tpu.matmul %39, %41, %cst_34 {dimension_numbers = #tpu.dot_dimension_numbers<[1], [0], [0], [1], [0, 0, 1, 1], [], []>} : vector<8x128xf32>, vector<128x128xf32>, vector<8x128xf32> -> vector<8x128xf32>
    %c5_35 = arith.constant 5 : index
    %c0_36 = arith.constant 0 : index
    %43 = vector.load %arg3[%c5_35, %c0_36] : memref<8x128xf32, #tpu.memory_space<vmem>>, vector<1x128xf32>
    %44 = vector.broadcast %43 : vector<1x128xf32> to vector<8x128xf32>
    %45 = arith.addf %42, %44 : vector<8x128xf32>
    %c0_37 = arith.constant 0 : index
    %c0_38 = arith.constant 0 : index
    %46 = vector.load %arg5[%c0_37, %c0_38] : memref<8x128xf32, #tpu.memory_space<vmem>>, vector<8x128xf32>
    tpu.vector_store %arg5[%c0_37, %c0_38], %45 {strides = array<i32>} : memref<8x128xf32, #tpu.memory_space<vmem>>, vector<8x128xf32>,
    return
  }
  func.func @transform_0(%arg0: i32) -> (i32, i32) {
    %c0_i32 = arith.constant 0 : i32
    %c0_i32_0 = arith.constant 0 : i32
    return %arg0, %c0_i32 : i32, i32
  }
  func.func @transform_1(%arg0: i32) -> (i32, i32, i32) {
    %c0_i32 = arith.constant 0 : i32
    %c0_i32_0 = arith.constant 0 : i32
    %c0_i32_1 = arith.constant 0 : i32
    %c0_i32_2 = arith.constant 0 : i32
    return %c0_i32, %c0_i32_0, %c0_i32_1 : i32, i32, i32
  }
  func.func @transform_2(%arg0: i32) -> (i32, i32) {
    %c0_i32 = arith.constant 0 : i32
    %c0_i32_0 = arith.constant 0 : i32
    %c0_i32_1 = arith.constant 0 : i32
    return %c0_i32, %c0_i32_0 : i32, i32
  }
  func.func @transform_3(%arg0: i32) -> (i32, i32) {
    %c0_i32 = arith.constant 0 : i32
    %c0_i32_0 = arith.constant 0 : i32
    return %arg0, %c0_i32 : i32, i32
  }
  func.func @transform_4(%arg0: i32) -> (i32, i32) {
    %c0_i32 = arith.constant 0 : i32
    %c0_i32_0 = arith.constant 0 : i32
    return %arg0, %c0_i32 : i32, i32
  }
}

</mosaic_0001>

<bundles_post_ra>
// kernel: tpu_custom_call.1
= control target key start
LH: loop header
LB: loop body
LE: loop exit
PB: predicated region body
PF: predicated region fallthrough
CT: control target
= control target key end

     0   :  { %10 = vsyncpa [#allocation3], 0  ;;  %s1388_s0 = inlined_call_operand.hbm [shape: f32[8,128], index: 0, kind: input, shape index: {}]   ;;  %s1389_s1 = inlined_call_operand.hbm [shape: f32[6,128,128], index: 1, kind: input, shape index: {}]   ;;  %s1390_s2 = inlined_call_operand.hbm [shape: f32[8,128], index: 2, kind: input, shape index: {}]   ;;  %s1391_s3 = inlined_call_operand.hbm [shape: f32[8,128], index: 3, kind: output, shape index: {0}]   ;;  %s1392_s4 = inlined_call_operand.hbm [shape: f32[8,128], index: 4, kind: output, shape index: {1}]  }
   0x1   :  { %11 = vsyncpa [#allocation6], 0 }
   0x2   :  { %12 = vsyncpa [#allocation4], 0 }
   0x3   :  { %13 = vsyncpa [#allocation10], 0  ;;  %s1233_s15 = smov [#allocation5]   ;;  %s1115_s19 = scalar_lea.hbm %s1389_s1, 12288 }
   0x4   :  { %s29_s16 = sshll.u32 %s1233_s15, 4  ;;  %p1116_p0 = scmp.ne.s32.totalorder %s1389_s1, %s1115_s19  ;;  %s30_s16 = int_to_ptr.vmem [resolvable:$true] %s29_s16 }
   0x5   :  { %p1119_p1 = scmp.lt.u32.totalorder %s1115_s19, %s1389_s1 }
   0x7   :  { %p1121_p2 = pnand %p1119_p1, %p1116_p0 }
   0x9   :  { %1124 = shalt.err (!%p1121_p2)
}
   0xa   :  { %s1125_s24 = scalar_lea.vmem %s30_s16, 12288  ;;  %p1130_p4 = scmp.lt.s32.totalorder %s30_s16, %s30_s16 }
   0xb   :  { %p1126_p3 = scmp.ne.s32.totalorder %s30_s16, %s1125_s24  ;;  %p1131_p5 = scmp.lt.s32.totalorder %s1125_s24, %s1125_s24 }
   0xd   :  { %p1132_p6 = por %p1131_p5, %p1130_p4 }
   0xf   :  { %p1133_p7 = pnand %p1132_p6, %p1126_p3 }
  0x11   :  { %1136 = shalt.err (!%p1133_p7)
}
  0x12   :  { %s1234_s25 = smov 128   ;;  %s1235_s26 = smov 8  }
  0x13   :  { %35 = dma.hbm_to_vmem [thread:$0]  %s1389_s1, 12288, %s30_s16, [#allocation6], %s1234_s25, %s1234_s25, %s1235_s26  }
  0x14   :  { %s1236_s29 = smov [#allocation2]   ;;  %s1237_s5 = smov [#allocation7]  }
  0x15   :  { %s20_s30 = sshll.u32 %s1236_s29, 4  ;;  %s42_s6 = sshll.u32 %s1237_s5, 4  ;;  %s21_s30 = int_to_ptr.vmem [resolvable:$true] %s20_s30  ;;  %s43_s6 = int_to_ptr.vmem [resolvable:$true] %s42_s6 }
  0x16   :  { %s1137_s9 = scalar_lea.hbm %s1388_s0, 128 }
  0x17   :  { %p1138_p8 = scmp.ne.s32.totalorder %s1388_s0, %s1137_s9  ;;  %p1141_p9 = scmp.lt.u32.totalorder %s1137_s9, %s1388_s0 }
  0x19   :  { %p1143_p10 = pnand %p1141_p9, %p1138_p8 }
  0x1b   :  { %1146 = shalt.err (!%p1143_p10)
}
  0x1c   :  { %s1147_s1 = scalar_lea.vmem %s21_s30, 128  ;;  %p1152_p12 = scmp.lt.s32.totalorder %s21_s30, %s21_s30 }
  0x1d   :  { %p1148_p11 = scmp.ne.s32.totalorder %s21_s30, %s1147_s1  ;;  %p1153_p13 = scmp.lt.s32.totalorder %s1147_s1, %s1147_s1 }
  0x1f   :  { %p1154_p0 = por %p1153_p13, %p1152_p12 }
  0x21   :  { %p1155_p1 = pnand %p1154_p0, %p1148_p11 }
  0x23   :  { %1158 = shalt.err (!%p1155_p1)
}
  0x24   :  { %23 = dma.hbm_to_vmem [thread:$0]  %s1388_s0, 128, %s21_s30, [#allocation3]  }
  0x25   :  { %s1159_s18 = scalar_lea.hbm %s1390_s2, 128 }
  0x26   :  { %p1160_p2 = scmp.ne.s32.totalorder %s1390_s2, %s1159_s18  ;;  %p1163_p3 = scmp.lt.u32.totalorder %s1159_s18, %s1390_s2 }
  0x28   :  { %p1165_p4 = pnand %p1163_p3, %p1160_p2 }
  0x2a   :  { %1168 = shalt.err (!%p1165_p4)
}
  0x2b   :  { %s1169_s23 = scalar_lea.vmem %s43_s6, 128  ;;  %p1174_p6 = scmp.lt.s32.totalorder %s43_s6, %s43_s6 }
  0x2c   :  { %p1170_p5 = scmp.ne.s32.totalorder %s43_s6, %s1169_s23  ;;  %p1175_p7 = scmp.lt.s32.totalorder %s1169_s23, %s1169_s23 }
  0x2e   :  { %p1176_p8 = por %p1175_p7, %p1174_p6 }
  0x30   :  { %p1177_p9 = pnand %p1176_p8, %p1170_p5 }
  0x32   :  { %1180 = shalt.err (!%p1177_p9)
}
  0x33   :  { %45 = dma.hbm_to_vmem [thread:$0]  %s1390_s2, 128, %s43_s6, [#allocation6]  }
  0x34   :  { %1225 = dma.done.wait [#allocation3], 128  }
  0x35   :  { %1226 = vsyncadd [#allocation3], 4294967168 }
  0x36   :  { %1227 = dma.done.wait [#allocation6], 12416  }
  0x37   :  { %1228 = vsyncadd [#allocation6], 4294954880  ;;  %v1238_v0 = vmov 0.0|0.0   ;;  %vm1239_vm0 = vmmov 0   ;;  %v1240_v1 = vmov 0.0   ;;  %v56_v2 = vld [vmem:[#allocation5] sm:$0xff] }
  0x38   :  { %961 = vmatprep.subr.bf16.mxu0 %v1238_v0  ;;  %783 = vmatprep.mubr.msk.f32.mxu0 %vm1239_vm0, %v1240_v1  ;;  %v57_v3 = vld [vmem:[#allocation5 + $0x8] sm:$0xff]  ;;  %v58_v4 = vld [vmem:[#allocation5 + $0x10] sm:$0xff]  ;;  %v59_v6 = vld [vmem:[#allocation5 + $0x18] sm:$0xff]  ;;  %s1241_s2 = smov [#allocation8]  }
  0x39   :  { %985 = vmatprep.subr.bf16.mxu1 %v1238_v0  ;;  %818 = vmatprep.mubr.msk.f32.mxu1 %vm1239_vm0, %v1240_v1  ;;  %v962_v5 = vpack.c.bf16 %v57_v3, %v56_v2  ;;  %v965_v7 = vpack.c.bf16 %v59_v6, %v58_v4  ;;  %v60_v8 = vld [vmem:[#allocation5 + $0x20] sm:$0xff]  ;;  %v61_v9 = vld [vmem:[#allocation5 + $0x28] sm:$0xff]  ;;  %v151_v12 = vld [vmem:[#allocation5 + $0x90] sm:$0xff]  ;;  %s619_s25 = sshll.u32 %s1241_s2, 4  ;;  %s620_s25 = int_to_ptr.vmem [resolvable:$true] %s619_s25 }
  0x3a   :  { %v149_v10 = vld [vmem:[#allocation5 + $0x80] sm:$0xff]  ;;  %v150_v11 = vld [vmem:[#allocation5 + $0x88] sm:$0xff]  ;;  %v152_v13 = vld [vmem:[#allocation5 + $0x98] sm:$0xff]  ;;  %v968_v14 = vpack.c.bf16 %v61_v9, %v60_v8  ;;  %s1181_s26 = scalar_lea.vmem %s620_s25, 128  ;;  %p1186_p11 = scmp.lt.s32.totalorder %s620_s25, %s620_s25 }
  0x3b   :  { %963 = vmatpush3.bf16.msra.mxu0 %v962_v5  ;;  %v986_v15 = vpack.c.bf16 %v150_v11, %v149_v10  ;;  %v62_v16 = vld [vmem:[#allocation5 + $0x30] sm:$0xff]  ;;  %v63_v17 = vld [vmem:[#allocation5 + $0x38] sm:$0xff]  ;;  %v989_v18 = vpack.c.bf16 %v152_v13, %v151_v12  ;;  %v153_v19 = vld [vmem:[#allocation5 + $0xa0] sm:$0xff]  ;;  %p1182_p10 = scmp.ne.s32.totalorder %s620_s25, %s1181_s26  ;;  %p1187_p12 = scmp.lt.s32.totalorder %s1181_s26, %s1181_s26 }
  0x3c   :  { %964 = vmatprep.subr.bf16.mxu0 %v1238_v0  ;;  %v154_v20 = vld [vmem:[#allocation5 + $0xa8] sm:$0xff]  ;;  %v971_v21 = vpack.c.bf16 %v63_v17, %v62_v16  ;;  %v64_v22 = vld [vmem:[#allocation5 + $0x40] sm:$0xff]  ;;  %v155_v25 = vld [vmem:[#allocation5 + $0xb0] sm:$0xff] }
  0x3d   :  { %987 = vmatpush3.bf16.msra.mxu1 %v986_v15  ;;  %v65_v23 = vld [vmem:[#allocation5 + $0x48] sm:$0xff]  ;;  %v992_v24 = vpack.c.bf16 %v154_v20, %v153_v19  ;;  %v156_v26 = vld [vmem:[#allocation5 + $0xb8] sm:$0xff]  ;;  %v66_v28 = vld [vmem:[#allocation5 + $0x50] sm:$0xff]  ;;  %p1188_p13 = por %p1187_p12, %p1186_p11 }
  0x3e   :  { %988 = vmatprep.subr.bf16.mxu1 %v1238_v0  ;;  %v974_v27 = vpack.c.bf16 %v65_v23, %v64_v22  ;;  %v67_v29 = vld [vmem:[#allocation5 + $0x58] sm:$0xff]  ;;  %v995_v30 = vpack.c.bf16 %v156_v26, %v155_v25  ;;  %v157_v31 = vld [vmem:[#allocation5 + $0xc0] sm:$0xff]  ;;  %v158_v32 = vld [vmem:[#allocation5 + $0xc8] sm:$0xff] }
  0x3f   :  { %966 = vmatpush3.bf16.msra.mxu0 %v965_v7  ;;  %v977_v33 = vpack.c.bf16 %v67_v29, %v66_v28  ;;  %v68_v34 = vld [vmem:[#allocation5 + $0x60] sm:$0xff]  ;;  %v69_v35 = vld [vmem:[#allocation5 + $0x68] sm:$0xff]  ;;  %v998_v36 = vpack.c.bf16 %v158_v32, %v157_v31  ;;  %v159_v37 = vld [vmem:[#allocation5 + $0xd0] sm:$0xff]  ;;  %p1189_p0 = pnand %p1188_p13, %p1182_p10 }
  0x40   :  { %967 = vmatprep.subr.bf16.mxu0 %v1238_v0  ;;  %v160_v38 = vld [vmem:[#allocation5 + $0xd8] sm:$0xff]  ;;  %v980_v39 = vpack.c.bf16 %v69_v35, %v68_v34  ;;  %v70_v40 = vld [vmem:[#allocation5 + $0x70] sm:$0xff]  ;;  %v161_v43 = vld [vmem:[#allocation5 + $0xe0] sm:$0xff] }
  0x41   :  { %990 = vmatpush3.bf16.msra.mxu1 %v989_v18  ;;  %v71_v41 = vld [vmem:[#allocation5 + $0x78] sm:$0xff]  ;;  %v1001_v42 = vpack.c.bf16 %v160_v38, %v159_v37  ;;  %v162_v44 = vld [vmem:[#allocation5 + $0xe8] sm:$0xff]  ;;  %v163_v48 = vld [vmem:[#allocation5 + $0xf0] sm:$0xff] }
  0x42   :  { %991 = vmatprep.subr.bf16.mxu1 %v1238_v0  ;;  %v983_v45 = vpack.c.bf16 %v71_v41, %v70_v40  ;;  %v1004_v46 = vpack.c.bf16 %v162_v44, %v161_v43  ;;  %v55_v47 = vld [vmem:[#allocation2] sm:$0xff]  ;;  %v242_v51 = vld [vmem:[#allocation5 + $0x100] sm:$0xff]  ;;  %v243_v52 = vld [vmem:[#allocation5 + $0x108] sm:$0xff] }
  0x43   :  { %969 = vmatpush3.bf16.msra.mxu0 %v968_v14  ;;  %v164_v49 = vld [vmem:[#allocation5 + $0xf8] sm:$0xff]  ;;  %v244_v53 = vld [vmem:[#allocation5 + $0x110] sm:$0xff]  ;;  %v1010_v54 = vpack.c.bf16 %v243_v52, %v242_v51  ;;  %v246_v57 = vld [vmem:[#allocation5 + $0x120] sm:$0xff] }
  0x44   :  { %970 = vmatprep.subr.bf16.mxu0 %v1238_v0  ;;  %v1007_v50 = vpack.c.bf16 %v164_v49, %v163_v48  ;;  %v245_v55 = vld [vmem:[#allocation5 + $0x118] sm:$0xff]  ;;  %v247_v58 = vld [vmem:[#allocation5 + $0x128] sm:$0xff]  ;;  %v248_v60 = vld [vmem:[#allocation5 + $0x130] sm:$0xff] }
  0x45   :  { %993 = vmatpush3.bf16.msra.mxu1 %v992_v24  ;;  %v1013_v56 = vpack.c.bf16 %v245_v55, %v244_v53  ;;  %v1016_v59 = vpack.c.bf16 %v247_v58, %v246_v57  ;;  %v249_v61 = vld [vmem:[#allocation5 + $0x138] sm:$0xff]  ;;  %v250_v63 = vld [vmem:[#allocation5 + $0x140] sm:$0xff]  ;;  %v251_v2 = vld [vmem:[#allocation5 + $0x148] sm:$0xff] }
  0x46   :  { %994 = vmatprep.subr.bf16.mxu1 %v1238_v0  ;;  %v1019_v62 = vpack.c.bf16 %v249_v61, %v248_v60  ;;  %v1022_v3 = vpack.c.bf16 %v251_v2, %v250_v63  ;;  %v252_v4 = vld [vmem:[#allocation5 + $0x150] sm:$0xff]  ;;  %v253_v5 = vld [vmem:[#allocation5 + $0x158] sm:$0xff]  ;;  %v254_v7 = vld [vmem:[#allocation5 + $0x160] sm:$0xff] }
  0x47   :  { %972 = vmatpush3.bf16.msra.mxu0 %v971_v21  ;;  %v1025_v6 = vpack.c.bf16 %v253_v5, %v252_v4  ;;  %v255_v8 = vld [vmem:[#allocation5 + $0x168] sm:$0xff]  ;;  %v643_v10 = vld [vmem:[#allocation7] ss:$0 sm:$0xff]  ;;  %v256_v15 = vld [vmem:[#allocation5 + $0x170] sm:$0xff] }
  0x48   :  { %973 = vmatprep.subr.bf16.mxu0 %v1238_v0  ;;  %v1028_v9 = vpack.c.bf16 %v255_v8, %v254_v7  ;;  %v257_v16 = vld [vmem:[#allocation5 + $0x178] sm:$0xff]  ;;  %v335_v18 = vld [vmem:[#allocation5 + $0x180] sm:$0xff]  ;;  %v336_v19 = vld [vmem:[#allocation5 + $0x188] sm:$0xff] }
  0x49   :  { %996 = vmatpush3.bf16.msra.mxu1 %v995_v30  ;;  %v1031_v17 = vpack.c.bf16 %v257_v16, %v256_v15  ;;  %v337_v20 = vld [vmem:[#allocation5 + $0x190] sm:$0xff]  ;;  %v1034_v21 = vpack.c.bf16 %v336_v19, %v335_v18  ;;  %v338_v22 = vld [vmem:[#allocation5 + $0x198] sm:$0xff]  ;;  %v339_v24 = vld [vmem:[#allocation5 + $0x1a0] sm:$0xff] }
  0x4a   :  { %997 = vmatprep.subr.bf16.mxu1 %v1238_v0  ;;  %v1037_v23 = vpack.c.bf16 %v338_v22, %v337_v20  ;;  %v340_v25 = vld [vmem:[#allocation5 + $0x1a8] sm:$0xff]  ;;  %v342_v28 = vld [vmem:[#allocation5 + $0x1b8] sm:$0xff]  ;;  %v343_v30 = vld [vmem:[#allocation5 + $0x1c0] sm:$0xff] }
  0x4b   :  { %975 = vmatpush3.bf16.msra.mxu0 %v974_v27  ;;  %v1040_v26 = vpack.c.bf16 %v340_v25, %v339_v24  ;;  %v341_v27 = vld [vmem:[#allocation5 + $0x1b0] sm:$0xff]  ;;  %v344_v31 = vld [vmem:[#allocation5 + $0x1c8] sm:$0xff]  ;;  %v346_v34 = vld [vmem:[#allocation5 + $0x1d8] sm:$0xff] }
  0x4c   :  { %976 = vmatprep.subr.bf16.mxu0 %v1238_v0  ;;  %v1043_v29 = vpack.c.bf16 %v342_v28, %v341_v27  ;;  %v1046_v32 = vpack.c.bf16 %v344_v31, %v343_v30  ;;  %v348_v37 = vld [vmem:[#allocation5 + $0x1e8] sm:$0xff]  ;;  %v349_v44 = vld [vmem:[#allocation5 + $0x1f0] sm:$0xff]  ;;  %v431_v51 = vld [vmem:[#allocation5 + $0x218] sm:$0xff] }
  0x4d   :  { %999 = vmatpush3.bf16.msra.mxu1 %v998_v36  ;;  %v347_v36 = vld [vmem:[#allocation5 + $0x1e0] sm:$0xff]  ;;  %v429_v48 = vld [vmem:[#allocation5 + $0x208] sm:$0xff]  ;;  %v430_v49 = vld [vmem:[#allocation5 + $0x210] sm:$0xff] }
  0x4e   :  { %1000 = vmatprep.subr.bf16.mxu1 %v1238_v0  ;;  %v1052_v38 = vpack.c.bf16 %v348_v37, %v347_v36  ;;  %v1061_v52 = vpack.c.bf16 %v431_v51, %v430_v49  ;;  %v432_v53 = vld [vmem:[#allocation5 + $0x220] sm:$0xff]  ;;  %v435_v57 = vld [vmem:[#allocation5 + $0x238] sm:$0xff]  ;;  %v437_v60 = vld [vmem:[#allocation5 + $0x248] sm:$0xff] }
  0x4f   :  { %978 = vmatpush3.bf16.msra.mxu0 %v977_v33  ;;  %v345_v33 = vld [vmem:[#allocation5 + $0x1d0] sm:$0xff]  ;;  %v439_v63 = vld [vmem:[#allocation5 + $0x258] sm:$0xff]  ;;  %v441_v4 = vld [vmem:[#allocation5 + $0x268] sm:$0xff] }
  0x50   :  { %979 = vmatprep.subr.bf16.mxu0 %v1238_v0  ;;  %v1049_v35 = vpack.c.bf16 %v346_v34, %v345_v33  ;;  %v523_v15 = vld [vmem:[#allocation5 + $0x290] sm:$0xff]  ;;  %v525_v19 = vld [vmem:[#allocation5 + $0x2a0] sm:$0xff]  ;;  %v526_v20 = vld [vmem:[#allocation5 + $0x2a8] sm:$0xff] }
  0x51   :  { %1002 = vmatpush3.bf16.msra.mxu1 %v1001_v42  ;;  %v528_v22 = vld [vmem:[#allocation5 + $0x2b8] sm:$0xff]  ;;  %v529_v24 = vld [vmem:[#allocation5 + $0x2c0] sm:$0xff]  ;;  %v530_v25 = vld [vmem:[#allocation5 + $0x2c8] sm:$0xff] }
  0x52   :  { %1003 = vmatprep.subr.bf16.mxu1 %v1238_v0  ;;  %v531_v27 = vld [vmem:[#allocation5 + $0x2d0] sm:$0xff]  ;;  %v532_v28 = vld [vmem:[#allocation5 + $0x2d8] sm:$0xff]  ;;  %v533_v30 = vld [vmem:[#allocation5 + $0x2e0] sm:$0xff] }
  0x53   :  { %981 = vmatpush3.bf16.msra.mxu0 %v980_v39  ;;  %v644_v39 = vld [vmem:[#allocation7 + $0x1] ss:$0 sm:$0xff]  ;;  %v534_v31 = vld [vmem:[#allocation5 + $0x2e8] sm:$0xff]  ;;  %v646_v33 = vld [vmem:[#allocation7 + $0x3] ss:$0 sm:$0xff] }
  0x54   :  { %982 = vmatprep.subr.bf16.mxu0 %v1238_v0 }
  0x55   :  { %1005 = vmatpush3.bf16.msra.mxu1 %v1004_v46 }
  0x56   :  { %1006 = vmatprep.subr.bf16.mxu1 %v1238_v0 }
  0x57   :  { %984 = vmatpush3.bf16.msra.mxu0 %v983_v45  ;;  %v350_v45 = vld [vmem:[#allocation5 + $0x1f8] sm:$0xff] }
  0x58   :  { %1009 = vmatprep.subr.bf16.mxu0 %v1238_v0  ;;  %v1055_v46 = vpack.c.bf16 %v350_v45, %v349_v44 }
  0x59   :  { %1008 = vmatpush3.bf16.msra.mxu1 %v1007_v50 }
  0x5a   :  { %784 = vmatmul.mubr.f32.vlgmr.msra.gmra.mrb[0].mxu0 %v55_v47  ;;  %1033 = vmatprep.subr.bf16.mxu1 %v1238_v0  ;;  %v428_v47 = vld [vmem:[#allocation5 + $0x200] sm:$0xff] }
  0x5b   :  { %853 = vmatprep.mubr.msk.f32.mxu0 %vm1239_vm0, %v1240_v1  ;;  %1011 = vmatpush3.bf16.msra.mxu0 %v1010_v54  ;;  %v1058_v50 = vpack.c.bf16 %v429_v48, %v428_v47  ;;  %v433_v54 = vld [vmem:[#allocation5 + $0x228] sm:$0xff] }
  0x5c   :  { %1012 = vmatprep.subr.bf16.mxu0 %v1238_v0  ;;  %v1064_v55 = vpack.c.bf16 %v433_v54, %v432_v53 }
  0x5f   :  { %1014 = vmatpush3.bf16.msra.mxu0 %v1013_v56  ;;  %v434_v56 = vld [vmem:[#allocation5 + $0x230] sm:$0xff] }
  0x60   :  { %1015 = vmatprep.subr.bf16.mxu0 %v1238_v0  ;;  %v1067_v58 = vpack.c.bf16 %v435_v57, %v434_v56 }
  0x63   :  { %1017 = vmatpush3.bf16.msra.mxu0 %v1016_v59  ;;  %v436_v59 = vld [vmem:[#allocation5 + $0x240] sm:$0xff] }
  0x64   :  { %1018 = vmatprep.subr.bf16.mxu0 %v1238_v0  ;;  %v1070_v61 = vpack.c.bf16 %v437_v60, %v436_v59 }
  0x67   :  { %1020 = vmatpush3.bf16.msra.mxu0 %v1019_v62  ;;  %v438_v62 = vld [vmem:[#allocation5 + $0x250] sm:$0xff] }
  0x68   :  { %1021 = vmatprep.subr.bf16.mxu0 %v1238_v0  ;;  %v1073_v2 = vpack.c.bf16 %v439_v63, %v438_v62 }
  0x6b   :  { %1023 = vmatpush3.bf16.msra.mxu0 %v1022_v3  ;;  %v440_v3 = vld [vmem:[#allocation5 + $0x260] sm:$0xff] }
  0x6c   :  { %1024 = vmatprep.subr.bf16.mxu0 %v1238_v0  ;;  %v1076_v5 = vpack.c.bf16 %v441_v4, %v440_v3 }
  0x6f   :  { %1026 = vmatpush3.bf16.msra.mxu0 %v1025_v6  ;;  %v645_v6 = vld [vmem:[#allocation7 + $0x2] ss:$0 sm:$0xff] }
  0x70   :  { %1027 = vmatprep.subr.bf16.mxu0 %v1238_v0 }
  0x73   :  { %1029 = vmatpush3.bf16.msra.mxu0 %v1028_v9 }
  0x74   :  { %1030 = vmatprep.subr.bf16.mxu0 %v1238_v0 }
  0x77   :  { %1032 = vmatpush3.bf16.msra.mxu0 %v1031_v17  ;;  %v524_v17 = vld [vmem:[#allocation5 + $0x298] sm:$0xff] }
  0x78   :  { %1057 = vmatprep.subr.bf16.mxu0 %v1238_v0  ;;  %v1085_v18 = vpack.c.bf16 %v524_v17, %v523_v15 }
 0x12d   :  { %v143_v11 = vpop.f32.mrb[0].mxu0 }
 0x12e   :  { %v144_v12 = vadd.f32 %v643_v10, %v143_v11  ;;  %v785_v13 = vpop.f32.mrb[1].mxu0  ;;  %v442_v10 = vld [vmem:[#allocation5 + $0x270] sm:$0xff]  ;;  %v443_v11 = vld [vmem:[#allocation5 + $0x278] sm:$0xff] }
 0x12f   :  { %v521_v13 = vld [vmem:[#allocation5 + $0x280] sm:$0xff] }
 0x130   :  { %v147_v14 = vmax.f32 %v144_v12, 0.0  ;;  %v1079_v12 = vpack.c.bf16 %v443_v11, %v442_v10 }
 0x132   :  { %819 = vmatmul.mubr.f32.vlgmr.msra.gmra.mrb[0].mxu1 %v147_v14  ;;  %v522_v14 = vld [vmem:[#allocation5 + $0x288] sm:$0xff] }
 0x133   :  { %888 = vmatprep.mubr.msk.f32.mxu1 %vm1239_vm0, %v1240_v1  ;;  %1035 = vmatpush3.bf16.msra.mxu1 %v1034_v21  ;;  %v1082_v16 = vpack.c.bf16 %v522_v14, %v521_v13  ;;  %v1088_v21 = vpack.c.bf16 %v526_v20, %v525_v19 }
 0x134   :  { %1036 = vmatprep.subr.bf16.mxu1 %v1238_v0 }
 0x137   :  { %1038 = vmatpush3.bf16.msra.mxu1 %v1037_v23 }
 0x138   :  { %1039 = vmatprep.subr.bf16.mxu1 %v1238_v0 }
 0x13b   :  { %1041 = vmatpush3.bf16.msra.mxu1 %v1040_v26  ;;  %v1094_v26 = vpack.c.bf16 %v530_v25, %v529_v24 }
 0x13c   :  { %1042 = vmatprep.subr.bf16.mxu1 %v1238_v0 }
 0x13f   :  { %1044 = vmatpush3.bf16.msra.mxu1 %v1043_v29  ;;  %v1097_v29 = vpack.c.bf16 %v532_v28, %v531_v27 }
 0x140   :  { %1045 = vmatprep.subr.bf16.mxu1 %v1238_v0 }
 0x143   :  { %1047 = vmatpush3.bf16.msra.mxu1 %v1046_v32  ;;  %v1100_v32 = vpack.c.bf16 %v534_v31, %v533_v30 }
 0x144   :  { %1048 = vmatprep.subr.bf16.mxu1 %v1238_v0 }
 0x147   :  { %1050 = vmatpush3.bf16.msra.mxu1 %v1049_v35 }
 0x148   :  { %1051 = vmatprep.subr.bf16.mxu1 %v1238_v0 }
 0x14b   :  { %1053 = vmatpush3.bf16.msra.mxu1 %v1052_v38  ;;  %v535_v38 = vld [vmem:[#allocation5 + $0x2f0] sm:$0xff] }
 0x14c   :  { %1054 = vmatprep.subr.bf16.mxu1 %v1238_v0 }
 0x14f   :  { %1056 = vmatpush3.bf16.msra.mxu1 %v1055_v46 }
 0x150   :  { %1081 = vmatprep.subr.bf16.mxu1 %v1238_v0 }
 0x205   :  { %v236_v40 = vpop.f32.mrb[0].mxu1 }
 0x206   :  { %v237_v41 = vadd.f32 %v644_v39, %v236_v40  ;;  %v820_v42 = vpop.f32.mrb[1].mxu1  ;;  %v536_v39 = vld [vmem:[#allocation5 + $0x2f8] sm:$0xff] }
 0x207   :  { %v1103_v40 = vpack.c.bf16 %v536_v39, %v535_v38 }
 0x208   :  { %v240_v43 = vmax.f32 %v237_v41, 0.0  ;;  %v647_v41 = vld [vmem:[#allocation7 + $0x4] ss:$0 sm:$0xff] }
 0x20a   :  { %854 = vmatmul.mubr.f32.vlgmr.msra.gmra.mrb[2].mxu0 %v240_v43 }
 0x20b   :  { %923 = vmatprep.mubr.msk.f32.mxu0 %vm1239_vm0, %v1240_v1  ;;  %1059 = vmatpush3.bf16.msra.mxu0 %v1058_v50 }
 0x20c   :  { %1060 = vmatprep.subr.bf16.mxu0 %v1238_v0 }
 0x20f   :  { %1062 = vmatpush3.bf16.msra.mxu0 %v1061_v52 }
 0x210   :  { %1063 = vmatprep.subr.bf16.mxu0 %v1238_v0 }
 0x213   :  { %1065 = vmatpush3.bf16.msra.mxu0 %v1064_v55 }
 0x214   :  { %1066 = vmatprep.subr.bf16.mxu0 %v1238_v0 }
 0x217   :  { %1068 = vmatpush3.bf16.msra.mxu0 %v1067_v58 }
 0x218   :  { %1069 = vmatprep.subr.bf16.mxu0 %v1238_v0 }
 0x21b   :  { %1071 = vmatpush3.bf16.msra.mxu0 %v1070_v61 }
 0x21c   :  { %1072 = vmatprep.subr.bf16.mxu0 %v1238_v0 }
 0x21f   :  { %1074 = vmatpush3.bf16.msra.mxu0 %v1073_v2 }
 0x220   :  { %1075 = vmatprep.subr.bf16.mxu0 %v1238_v0 }
 0x223   :  { %1077 = vmatpush3.bf16.msra.mxu0 %v1076_v5 }
 0x224   :  { %1078 = vmatprep.subr.bf16.mxu0 %v1238_v0 }
 0x227   :  { %1080 = vmatpush3.bf16.msra.mxu0 %v1079_v12 }
 0x2dd   :  { %v329_v7 = vpop.f32.mrb[2].mxu0 }
 0x2de   :  { %v330_v8 = vadd.f32 %v645_v6, %v329_v7  ;;  %v855_v9 = vpop.f32.mrb[3].mxu0 }
 0x2e0   :  { %333 = vst [vmem:[#allocation8] sm:$0xff] %v330_v8  ;;  %889 = vmatmul.mubr.f32.vlgmr.msra.gmra.mrb[2].mxu1 %v330_v8 }
 0x2e1   :  { %958 = vmatprep.mubr.msk.f32.mxu1 %vm1239_vm0, %v1240_v1  ;;  %1083 = vmatpush3.bf16.msra.mxu1 %v1082_v16  ;;  %v527_v1 = vld [vmem:[#allocation5 + $0x2b0] sm:$0xff] }
 0x2e2   :  { %1084 = vmatprep.subr.bf16.mxu1 %v1238_v0  ;;  %v1091_v23 = vpack.c.bf16 %v528_v22, %v527_v1 }
 0x2e5   :  { %1086 = vmatpush3.bf16.msra.mxu1 %v1085_v18 }
 0x2e6   :  { %1087 = vmatprep.subr.bf16.mxu1 %v1238_v0 }
 0x2e9   :  { %1089 = vmatpush3.bf16.msra.mxu1 %v1088_v21 }
 0x2ea   :  { %1090 = vmatprep.subr.bf16.mxu1 %v1238_v0 }
 0x2ed   :  { %1092 = vmatpush3.bf16.msra.mxu1 %v1091_v23 }
 0x2ee   :  { %1093 = vmatprep.subr.bf16.mxu1 %v1238_v0 }
 0x2f1   :  { %1095 = vmatpush3.bf16.msra.mxu1 %v1094_v26 }
 0x2f2   :  { %1096 = vmatprep.subr.bf16.mxu1 %v1238_v0 }
 0x2f5   :  { %1098 = vmatpush3.bf16.msra.mxu1 %v1097_v29 }
 0x2f6   :  { %1099 = vmatprep.subr.bf16.mxu1 %v1238_v0 }
 0x2f9   :  { %1101 = vmatpush3.bf16.msra.mxu1 %v1100_v32 }
 0x2fa   :  { %1102 = vmatprep.subr.bf16.mxu1 %v1238_v0 }
 0x2fd   :  { %1104 = vmatpush3.bf16.msra.mxu1 %v1103_v40 }
 0x3b3   :  { %v422_v34 = vpop.f32.mrb[2].mxu1 }
 0x3b4   :  { %v423_v35 = vadd.f32 %v646_v33, %v422_v34  ;;  %v890_v36 = vpop.f32.mrb[3].mxu1 }
 0x3b6   :  { %v426_v37 = vmax.f32 %v423_v35, 0.0 }
 0x3b8   :  { %924 = vmatmul.mubr.f32.vlgmr.msra.gmra.mrb[4].mxu0 %v426_v37 }
 0x48b   :  { %v515_v42 = vpop.f32.mrb[4].mxu0 }
 0x48c   :  { %v516_v43 = vadd.f32 %v647_v41, %v515_v42  ;;  %v925_v44 = vpop.f32.mrb[5].mxu0 }
 0x48e   :  { %v519_v45 = vmax.f32 %v516_v43, 0.0 }
 0x490   :  { %959 = vmatmul.mubr.f32.vlgmr.msra.gmra.mrb[4].mxu1 %v519_v45 }
 0x491   :  { %1192 = shalt.err (!%p1189_p0)
}
 0x492   :  { %s1193_s29 = scalar_lea.hbm %s1391_s3, 128 }
 0x493   :  { %p1194_p1 = scmp.ne.s32.totalorder %s1391_s3, %s1193_s29  ;;  %p1197_p2 = scmp.lt.u32.totalorder %s1193_s29, %s1391_s3 }
 0x495   :  { %p1199_p3 = pnand %p1197_p2, %p1194_p1 }
 0x497   :  { %1202 = shalt.err (!%p1199_p3)
}
 0x498   :  { %622 = dma.vmem_to_hbm [thread:$0]  %s620_s25, 128, %s1391_s3, [#allocation4]   ;;  %v648_v0 = vld [vmem:[#allocation7 + $0x5] ss:$0 sm:$0xff] }
 0x499   :  { %s1242_s10 = smov [#allocation9]  }
 0x49a   :  { %s629_s11 = sshll.u32 %s1242_s10, 4  ;;  %s630_s11 = int_to_ptr.vmem [resolvable:$true] %s629_s11 }
 0x49b   :  { %s1203_s12 = scalar_lea.vmem %s630_s11, 128  ;;  %p1208_p5 = scmp.lt.s32.totalorder %s630_s11, %s630_s11 }
 0x49c   :  { %p1204_p4 = scmp.ne.s32.totalorder %s630_s11, %s1203_s12  ;;  %p1209_p6 = scmp.lt.s32.totalorder %s1203_s12, %s1203_s12 }
 0x49e   :  { %p1210_p7 = por %p1209_p6, %p1208_p5 }
 0x4a0   :  { %p1211_p8 = pnand %p1210_p7, %p1204_p4 }
 0x563   :  { %v608_v46 = vpop.f32.mrb[4].mxu1 }
 0x564   :  { %v609_v47 = vadd.f32 %v648_v0, %v608_v46  ;;  %v960_v48 = vpop.f32.mrb[5].mxu1 }
 0x566   :  { %612 = vst [vmem:[#allocation9] sm:$0xff] %v609_v47 }
 0x567   :  { %1214 = shalt.err (!%p1211_p8)
}
 0x568   :  { %s1215_s14 = scalar_lea.hbm %s1392_s4, 128 }
 0x569   :  { %p1216_p9 = scmp.ne.s32.totalorder %s1392_s4, %s1215_s14  ;;  %p1219_p10 = scmp.lt.u32.totalorder %s1215_s14, %s1392_s4 }
 0x56b   :  { %p1221_p11 = pnand %p1219_p10, %p1216_p9 }
 0x56d   :  { %1224 = shalt.err (!%p1221_p11)
}
 0x56e   :  { %632 = dma.vmem_to_hbm [thread:$0]  %s630_s11, 128, %s1392_s4, [#allocation10]  }
 0x56f   :  { %1229 = dma.done.wait [#allocation4], 128  }
 0x570   :  { %1230 = vsyncadd [#allocation4], 4294967168 }
 0x571   :  { %1231 = dma.done.wait [#allocation10], 128  }
 0x572   :  { %1232 = vsyncadd [#allocation10], 4294967168 }
 0x573   :  { %639 = vsyncpa [#allocation3], 1 }
 0x574   :  { %640 = vsyncpa [#allocation6], 1 }
 0x575   :  { %641 = vsyncpa [#allocation4], 1 }
 0x576   :  { %642 = vsyncpa [#allocation10], 1 }

</bundles_post_ra>
